<compile_context>
chip_gen: v6e
topology: v6e:2x2x1
jax: 0.10.0
libtpu: 0.0.40
codegen_flags: <defaults>
</compile_context>

<pallas_src>
import math

import jax
import jax.numpy as jnp
import numpy as np
from jax.experimental import pallas as pl
from jax.experimental.pallas import tpu as pltpu


def _largest_aligned_divisor(total: int, align: int, cap: int):
    """Largest d <= cap with d % align == 0 and total % d == 0, else None."""
    cap = min(cap, total)
    d = (cap // align) * align
    while d >= align:
        if total % d == 0:
            return d
        d -= align
    return None


def _copy_kernel(idx_ref, x_ref, o_ref):
    # Chunk selection already happened in the input index_map (scalar prefetch).
    del idx_ref
    o_ref[...] = x_ref[...]


def _select_kernel(idx_ref, x_ref, o_ref):
    # x_ref: (1, 1, size, inner) -> o_ref: (1, size, inner)
    del idx_ref
    o_ref[...] = x_ref[0]


def split_pallas(tensor, index, dim: int = 0, split: int = 0):
    """Pallas equivalent of the moai Split module's forward pass."""
    shape = tuple(int(s) for s in tensor.shape)
    ndim = len(shape)
    dim = dim % ndim
    size = split if split else shape[dim] // 2
    assert size > 0, "split size must be positive"
    # TODO(synk): torch.split allows a ragged last chunk; with a runtime `index`
    # the output shape would be data-dependent, so even divisibility is required.
    assert shape[dim] % size == 0, "shape[dim] must be divisible by the split size"
    n_chunks = shape[dim] // size

    rows = math.prod(shape[:dim])           # product of dims before `dim`
    inner = math.prod(shape[dim + 1:])      # product of dims after `dim`
    chunk_cols = size * inner               # one chunk's elements per outer row
    total_cols = n_chunks * chunk_cols

    dtype = tensor.dtype
    itemsize = np.dtype(dtype).itemsize
    out_shape_full = shape[:dim] + (size,) + shape[dim + 1:]

    idx = jnp.clip(jnp.asarray(index, dtype=jnp.int32).reshape(1), 0, n_chunks - 1)

    if chunk_cols % 128 == 0:
        # ---------------- lane-dense fast path ----------------
        x2 = tensor.reshape(rows, total_cols)
        bc = _largest_aligned_divisor(chunk_cols, 128, 8192)
        blocks_per_chunk = chunk_cols // bc
        sublane_align = max(8, 32 // itemsize)     # 8 f32, 16 bf16, 32 int8
        row_cap = max(1, (1 << 20) // (bc * itemsize))  # ~1 MiB per block
        if rows <= row_cap:
            br = rows
        else:
            br = _largest_aligned_divisor(rows, sublane_align, row_cap) or rows
        grid = (rows // br, chunk_cols // bc)

        out2 = pl.pallas_call(
            _copy_kernel,
            out_shape=jax.ShapeDtypeStruct((rows, chunk_cols), dtype),
            grid_spec=pltpu.PrefetchScalarGridSpec(
                num_scalar_prefetch=1,
                grid=grid,
                in_specs=[pl.BlockSpec(
                    (br, bc),
                    lambda i, j, idx_ref: (i, idx_ref[0] * blocks_per_chunk + j))],
                out_specs=pl.BlockSpec((br, bc), lambda i, j, idx_ref: (i, j)),
            ),
            compiler_params=pltpu.CompilerParams(
                dimension_semantics=("parallel", "parallel")),
        )(idx, x2)
        out = out2.reshape(out_shape_full)
    else:
        # ---------------- general fallback (any alignment) ----------------
        x4 = tensor.reshape(rows, n_chunks, size, inner)
        out3 = pl.pallas_call(
            _select_kernel,
            out_shape=jax.ShapeDtypeStruct((rows, size, inner), dtype),
            grid_spec=pltpu.PrefetchScalarGridSpec(
                num_scalar_prefetch=1,
                grid=(rows,),
                in_specs=[pl.BlockSpec(
                    (1, 1, size, inner),
                    lambda r, idx_ref: (r, idx_ref[0], 0, 0))],
                out_specs=pl.BlockSpec(
                    (1, size, inner), lambda r, idx_ref: (r, 0, 0)),
            ),
            compiler_params=pltpu.CompilerParams(
                dimension_semantics=("parallel",)),
        )(idx, x4)
        out = out3.reshape(out_shape_full)

    if size == 1:
        out = out.reshape(shape[:dim] + shape[dim + 1:])   # squeeze(dim)
    return out


def _split_reference(tensor, index, dim=0, split=0):
    """Pure-JAX reference matching the PyTorch module."""
    ndim = tensor.ndim
    d = dim % ndim
    size = split if split else tensor.shape[d] // 2
    start = [0] * ndim
    start[d] = int(index) * size
    sizes = list(tensor.shape)
    sizes[d] = size
    r = jax.lax.dynamic_slice(tensor, start, sizes)
    return jnp.squeeze(r, axis=d) if size == 1 else r


if __name__ == "__main__":
    key = jax.random.PRNGKey(0)
    x = jax.random.normal(key, (2, 4, 16, 16), dtype=jnp.float32)

    # Case 1: module defaults (dim=0, split=0 -> chunk size 1), squeezes dim 0.
    out1 = jax.block_until_ready(split_pallas(x, jnp.asarray(1, jnp.int32),
                                              dim=0, split=0))
    ref1 = _split_reference(x, 1, dim=0, split=0)
    assert out1.shape == ref1.shape == (4, 16, 16), out1.shape
    np.testing.assert_array_equal(np.asarray(out1), np.asarray(ref1))

    # Case 2: channel split (dim=1, split=2) -> lane-dense fast path, no squeeze.
    out2 = jax.block_until_ready(split_pallas(x, jnp.asarray(0, jnp.int32),
                                              dim=1, split=2))
    ref2 = _split_reference(x, 0, dim=1, split=2)
    assert out2.shape == ref2.shape == (2, 2, 16, 16), out2.shape
    np.testing.assert_array_equal(np.asarray(out2), np.asarray(ref2))

    # Case 3: spatial split (dim=2, split=4): chunk width 64 (not 128-aligned)
    # -> exercises the general fallback path.
    out3 = jax.block_until_ready(split_pallas(x, jnp.asarray(3, jnp.int32),
                                              dim=2, split=4))
    ref3 = _split_reference(x, 3, dim=2, split=4)
    assert out3.shape == ref3.shape == (2, 4, 4, 16), out3.shape
    np.testing.assert_array_equal(np.asarray(out3), np.asarray(ref3))

    print("KERNEL_OK")
</pallas_src>

<mosaic_0001>
module attributes {stable_mosaic.version = 11 : i64} {
  func.func @_copy_kernel(%arg0: i32, %arg1: i32, %arg2: memref<1xi32, #tpu.memory_space<smem>>, %arg3: memref<1x1024xf32, #tpu.memory_space<vmem>>, %arg4: memref<1x1024xf32, #tpu.memory_space<vmem>>) attributes {dimension_semantics = [#tpu.dimension_semantics<parallel>, #tpu.dimension_semantics<parallel>], iteration_bounds = array<i64: 1, 1>, scalar_prefetch = 1 : i64, scratch_operands = 0 : i64, tpu.core_type = #tpu.core_type<tc>, window_params = [{transform_indices = @transform_0, window_bounds = array<i64: 1, 1024>}, {transform_indices = @transform_1, window_bounds = array<i64: 1, 1024>}]} {
    %c0 = arith.constant 0 : index
    %c0_0 = arith.constant 0 : index
    %0 = vector.load %arg3[%c0, %c0_0] : memref<1x1024xf32, #tpu.memory_space<vmem>>, vector<1x1024xf32>
    %c0_1 = arith.constant 0 : index
    %c0_2 = arith.constant 0 : index
    %1 = vector.load %arg4[%c0_1, %c0_2] : memref<1x1024xf32, #tpu.memory_space<vmem>>, vector<1x1024xf32>
    tpu.vector_store %arg4[%c0_1, %c0_2], %0 {strides = array<i32>} : memref<1x1024xf32, #tpu.memory_space<vmem>>, vector<1x1024xf32>,
    return
  }
  func.func @transform_0(%arg0: i32, %arg1: i32, %arg2: memref<1xi32, #tpu.memory_space<smem>>) -> (i32, i32) {
    %c0 = arith.constant 0 : index
    %0 = memref.load %arg2[%c0] : memref<1xi32, #tpu.memory_space<smem>>
    %c1_i32 = arith.constant 1 : i32
    %1 = arith.muli %0, %c1_i32 : i32
    %2 = arith.addi %1, %arg1 : i32
    %c0_i32 = arith.constant 0 : i32
    return %arg0, %2 : i32, i32
  }
  func.func @transform_1(%arg0: i32, %arg1: i32, %arg2: memref<1xi32, #tpu.memory_space<smem>>) -> (i32, i32) {
    %c0_i32 = arith.constant 0 : i32
    return %arg0, %arg1 : i32, i32
  }
}

</mosaic_0001>

<bundles_post_ra>
// kernel: tpu_custom_call.1
= control target key start
LH: loop header
LB: loop body
LE: loop exit
PB: predicated region body
PF: predicated region fallthrough
CT: control target
= control target key end

     0   :  { %8 = vsyncpa [#allocation5], 0  ;;  %s133_s0 = inlined_call_operand.<no memory space> [shape: s32[1], index: 0, kind: input, shape index: {}]   ;;  %s134_s1 = inlined_call_operand.hbm [shape: f32[1,2048], index: 1, kind: input, shape index: {}]   ;;  %s135_s2 = inlined_call_operand.hbm [shape: f32[1,1024], index: 2, kind: output, shape index: {}]  }
   0x1   :  { %9 = vsyncpa [#allocation6], 0  ;;  %s52_s11 = sshll.u32 %s133_s0, 7  ;;  %s101_s15 = smov [#allocation4]  }
   0x2   :  { %s19_s14 = scalar_lea.hbm %s134_s1, %s52_s11  ;;  %s21_s16 = sshll.u32 %s101_s15, 4  ;;  %s22_s16 = int_to_ptr.vmem [resolvable:$true] %s21_s16 }
   0x3   :  { %s55_s17 = scalar_lea.hbm %s19_s14, 128  ;;  %s57_s20 = scalar_lea.hbm %s134_s1, 256 }
   0x4   :  { %p56_p0 = scmp.ne.s32.totalorder %s19_s14, %s55_s17  ;;  %p58_p1 = scmp.lt.s32.totalorder %s19_s14, %s134_s1 }
   0x5   :  { %p59_p2 = scmp.lt.s32.totalorder %s57_s20, %s55_s17 }
   0x7   :  { %p60_p3 = por %p59_p2, %p58_p1 }
   0x9   :  { %p61_p4 = pnand %p60_p3, %p56_p0 }
   0xb   :  { %64 = shalt.err (!%p61_p4)
}
   0xc   :  { %s65_s0 = scalar_lea.vmem %s22_s16, 128  ;;  %p70_p6 = scmp.lt.s32.totalorder %s22_s16, %s22_s16 }
   0xd   :  { %p66_p5 = scmp.ne.s32.totalorder %s22_s16, %s65_s0  ;;  %p71_p7 = scmp.lt.s32.totalorder %s65_s0, %s65_s0 }
   0xf   :  { %p72_p8 = por %p71_p7, %p70_p6 }
  0x11   :  { %p73_p9 = pnand %p72_p8, %p66_p5 }
  0x13   :  { %76 = shalt.err (!%p73_p9)
}
  0x14   :  { %24 = dma.hbm_to_vmem [thread:$0]  %s19_s14, 128, %s22_s16, [#allocation5]  }
  0x15   :  { %97 = dma.done.wait [#allocation5], 128  }
  0x16   :  { %98 = vsyncadd [#allocation5], 4294967168  ;;  %s102_s23 = smov [#allocation7]   ;;  %v31_v0 = vld [vmem:[#allocation4] sm:$0xff] }
  0x17   :  { %s39_s24 = sshll.u32 %s102_s23, 4  ;;  %32 = vst [vmem:[#allocation7] sm:$0xff] %v31_v0  ;;  %s40_s24 = int_to_ptr.vmem [resolvable:$true] %s39_s24 }
  0x18   :  { %s77_s1 = scalar_lea.vmem %s40_s24, 128  ;;  %p82_p11 = scmp.lt.s32.totalorder %s40_s24, %s40_s24 }
  0x19   :  { %p78_p10 = scmp.ne.s32.totalorder %s40_s24, %s77_s1  ;;  %p83_p12 = scmp.lt.s32.totalorder %s77_s1, %s77_s1 }
  0x1b   :  { %p84_p13 = por %p83_p12, %p82_p11 }
  0x1d   :  { %p85_p0 = pnand %p84_p13, %p78_p10 }
  0x1f   :  { %88 = shalt.err (!%p85_p0)
}
  0x20   :  { %42 = dma.vmem_to_hbm [thread:$0]  %s40_s24, 128, %s135_s2, [#allocation6]  }
  0x21   :  { %99 = dma.done.wait [#allocation6], 128  }
  0x22   :  { %100 = vsyncadd [#allocation6], 4294967168 }
  0x23   :  { %46 = vsyncpa [#allocation5], 1 }
  0x24   :  { %47 = vsyncpa [#allocation6], 1 }

</bundles_post_ra>
